<compile_context>
chip_gen: v6e
topology: v6e:2x2x1
jax: 0.10.0
libtpu: 0.0.40
codegen_flags: <defaults>
</compile_context>

<pallas_src>
import jax
import jax.numpy as jnp
import numpy as np
from jax.experimental import pallas as pl
from jax.experimental.pallas import tpu as pltpu


def _round_up(v, m):
    return ((v + m - 1) // m) * m


def protonet_metric_kernel(alpha_ref, x_ref, proto_ref, psq_ref, out_ref):
    # alpha_ref: SMEM (1,) scalar parameter
    # x_ref:     (TN, D)  VMEM row tile (unpadded feature dim)
    # proto_ref: (TP, D)  VMEM prototype tile (resident when grid[1] == 1)
    # psq_ref:   (1, TP)  VMEM hoisted ||p||^2 row vector
    # out_ref:   (TN, TP) VMEM output tile
    scale = jnp.square(alpha_ref[0] + jnp.float32(1e-16))

    x = x_ref[...]                                             # (TN, D) f32

    # Cross term on the MXU: contract the feature dim of both operands
    # (avoids materializing p.T).
    xp = jax.lax.dot_general(
        x, proto_ref[...],
        dimension_numbers=(((1,), (1,)), ((), ())),
        preferred_element_type=jnp.float32)                    # (TN, TP)

    x_sq = jnp.sum(x * x, axis=-1, keepdims=True)              # (TN, 1)

    d = x_sq + psq_ref[...] - 2.0 * xp                         # (TN, TP)
    # The matmul identity can go slightly negative from cancellation; clamp.
    d = jnp.maximum(d, 0.0)

    out_ref[...] = (scale * d).astype(out_ref.dtype)


def _vmem_budget():
    """Generation-aware VMEM plan: (planning budget, compiler vmem limit)."""
    try:
        cap = int(pltpu.get_tpu_info().vmem_capacity_bytes)
    except Exception:
        cap = 64 * 1024 * 1024   # conservative fallback: v7x per-TensorCore VMEM
    # Leave ~1/4 of capacity for Mosaic internal scratch / pipeline overhead.
    limit = max(16 * 1024 * 1024, cap * 3 // 4)
    budget = limit - 2 * 1024 * 1024
    return budget, limit


def _choose_tiles(n, d, p, budget):
    """Pick (tile_n, tile_p, proto_buffers) so all live VMEM buffers fit."""
    b = 4  # f32 bytes
    # Prefer keeping all prototypes (+ hoisted ||p||^2) resident as a single
    # single-buffered block; tile over P only when that would eat > half VMEM.
    if p * (d + 1) * b <= budget // 2:
        tile_p, p_bufs = p, 1
    else:
        p_bufs = 2
        tile_p = ((budget // 2) // (p_bufs * (d + 1) * b)) // 128 * 128
        tile_p = max(128, min(tile_p, _round_up(p, 128)))
        if tile_p >= p:            # degenerate corner (tiny P, huge D)
            tile_p, p_bufs = p, 1
    remaining = budget - p_bufs * tile_p * (d + 1) * b

    if n < 8:
        return n, tile_p, p_bufs   # full-dim row block (legal for any N)

    tile_n = 8
    for t in (4096, 2048, 1024, 512, 256, 128, 64, 32, 16, 8):
        if t > n:
            continue
        # double-buffered x tile + double-buffered output tile
        if 2 * t * (d + tile_p) * b <= remaining:
            tile_n = t
            break
    return tile_n, tile_p, p_bufs


def protonet_metric(x, prototypes, alpha, *, tile_n=None, tile_p=None):
    n, d = x.shape
    p, d2 = prototypes.shape
    assert d == d2, "x and prototypes must share the feature dimension"

    budget, vmem_limit = _vmem_budget()
    auto_n, auto_p, _ = _choose_tiles(n, d, p, budget)
    if tile_n is None:
        tile_n = auto_n
    if tile_p is None:
        tile_p = auto_p

    # No HBM-side padding: x streams exactly N*D f32, output writes exactly
    # N*P f32 (partial edge blocks are masked by Pallas).
    x = x.astype(jnp.float32)
    prototypes = prototypes.astype(jnp.float32)
    # Hoisted prototype norms: computed once, reused by every row tile.
    p_sq = jnp.sum(prototypes * prototypes, axis=-1, keepdims=True).T  # (1, P)

    alpha = jnp.asarray(alpha, jnp.float32).reshape((1,))

    grid = (pl.cdiv(n, tile_n), pl.cdiv(p, tile_p))
    proto_is_grid_invariant = grid[1] == 1

    def build(single_buffer_invariants):
        # Grid-invariant blocks (prototypes, ||p||^2) don't need double
        # buffering; dropping the extra buffer frees VMEM for larger row tiles.
        mode = (dict(pipeline_mode=pl.Buffered(1))
                if single_buffer_invariants else {})
        return pl.pallas_call(
            protonet_metric_kernel,
            out_shape=jax.ShapeDtypeStruct((n, p), jnp.float32),
            grid_spec=pltpu.PrefetchScalarGridSpec(
                num_scalar_prefetch=0,
                grid=grid,
                in_specs=[
                    pl.BlockSpec(memory_space=pltpu.SMEM),                   # alpha
                    pl.BlockSpec((tile_n, d), lambda i, j: (i, 0)),          # x rows
                    pl.BlockSpec((tile_p, d), lambda i, j: (j, 0), **mode),  # protos
                    pl.BlockSpec((1, tile_p), lambda i, j: (0, j), **mode),  # ||p||^2
                ],
                out_specs=pl.BlockSpec((tile_n, tile_p), lambda i, j: (i, j)),
            ),
            compiler_params=pltpu.CompilerParams(
                dimension_semantics=("parallel", "arbitrary"),
                vmem_limit_bytes=vmem_limit),
        )

    args = (alpha, x, prototypes, p_sq)
    if proto_is_grid_invariant:
        try:
            return build(True)(*args)
        except Exception:
            pass   # Buffered(1) unsupported on this jax version: default buffering.
    return build(False)(*args)


def protonet_metric_ref(x, prototypes, alpha):
    diff = x[:, None, :] - prototypes[None, :, :]
    sq_dist = jnp.sum(diff * diff, axis=-1)
    return jnp.square(alpha[0] + 1e-16) * sq_dist


if __name__ == "__main__":
    key = jax.random.PRNGKey(0)
    kx, kp = jax.random.split(key)

    N, D, P = 16, 32, 4
    x = jax.random.normal(kx, (N, D), dtype=jnp.float32)
    prototypes = jax.random.normal(kp, (P, D), dtype=jnp.float32)
    # Deterministic parameter init, matching torch.nn.Parameter(torch.ones(1)).
    alpha = jnp.ones((1,), dtype=jnp.float32)

    out = protonet_metric(x, prototypes, alpha)
    out = jax.block_until_ready(out)

    ref = protonet_metric_ref(x, prototypes, alpha)
    assert out.shape == (N, P) and out.dtype == jnp.float32
    # Tolerance covers MXU rounding / cancellation in the norm identity;
    # formula bugs would be O(1).
    assert np.allclose(np.asarray(out), np.asarray(ref), rtol=5e-3, atol=5e-3)

    print("KERNEL_OK")
</pallas_src>

<mosaic_0001>
module attributes {stable_mosaic.version = 11 : i64} {
  func.func @protonet_metric_kernel(%arg0: i32, %arg1: i32, %arg2: memref<1xf32, #tpu.memory_space<smem>>, %arg3: memref<16x32xf32, #tpu.memory_space<vmem>>, %arg4: memref<4x32xf32, #tpu.memory_space<vmem>>, %arg5: memref<1x4xf32, #tpu.memory_space<vmem>>, %arg6: memref<16x4xf32, #tpu.memory_space<vmem>>) attributes {dimension_semantics = [#tpu.dimension_semantics<parallel>, #tpu.dimension_semantics<arbitrary>], iteration_bounds = array<i64: 1, 1>, scalar_prefetch = 0 : i64, scratch_operands = 0 : i64, tpu.core_type = #tpu.core_type<tc>, window_params = [{transform_indices = @transform_0, window_bounds = array<i64: 1>}, {transform_indices = @transform_1, window_bounds = array<i64: 16, 32>}, {pipeline_mode = #tpu.pipeline_mode<synchronous>, transform_indices = @transform_2, window_bounds = array<i64: 4, 32>}, {pipeline_mode = #tpu.pipeline_mode<synchronous>, transform_indices = @transform_3, window_bounds = array<i64: 1, 4>}, {transform_indices = @transform_4, window_bounds = array<i64: 16, 4>}]} {
    %c0 = arith.constant 0 : index
    %0 = memref.load %arg2[%c0] : memref<1xf32, #tpu.memory_space<smem>>
    %cst = arith.constant 1.000000e-16 : f32
    %1 = arith.addf %0, %cst : f32
    %2 = arith.mulf %1, %1 : f32
    %c0_0 = arith.constant 0 : index
    %c0_1 = arith.constant 0 : index
    %3 = vector.load %arg3[%c0_0, %c0_1] : memref<16x32xf32, #tpu.memory_space<vmem>>, vector<16x32xf32>
    %c0_2 = arith.constant 0 : index
    %c0_3 = arith.constant 0 : index
    %4 = vector.load %arg4[%c0_2, %c0_3] : memref<4x32xf32, #tpu.memory_space<vmem>>, vector<4x32xf32>
    %cst_4 = arith.constant dense<0.000000e+00> : vector<16x4xf32>
    %5 = tpu.matmul %3, %4, %cst_4 {dimension_numbers = #tpu.dot_dimension_numbers<[1], [1], [0], [0], [0, 0, 1, 0], [], []>} : vector<16x32xf32>, vector<4x32xf32>, vector<16x4xf32> -> vector<16x4xf32>
    %6 = arith.mulf %3, %3 : vector<16x32xf32>
    %cst_5 = arith.constant dense<0.000000e+00> : vector<16xf32>
    %7 = vector.multi_reduction <add>, %6, %cst_5 [1] : vector<16x32xf32> to vector<16xf32>
    %8 = vector.shape_cast %7 : vector<16xf32> to vector<16x1xf32>
    %c0_6 = arith.constant 0 : index
    %c0_7 = arith.constant 0 : index
    %9 = vector.load %arg5[%c0_6, %c0_7] : memref<1x4xf32, #tpu.memory_space<vmem>>, vector<1x4xf32>
    %10 = vector.broadcast %8 : vector<16x1xf32> to vector<16x4xf32>
    %11 = vector.broadcast %9 : vector<1x4xf32> to vector<16x4xf32>
    %12 = arith.addf %10, %11 : vector<16x4xf32>
    %cst_8 = arith.constant 2.000000e+00 : f32
    %13 = vector.broadcast %cst_8 : f32 to vector<16x4xf32>
    %14 = arith.mulf %13, %5 : vector<16x4xf32>
    %15 = arith.subf %12, %14 : vector<16x4xf32>
    %cst_9 = arith.constant 0.000000e+00 : f32
    %16 = vector.broadcast %cst_9 : f32 to vector<16x4xf32>
    %17 = arith.maximumf %15, %16 : vector<16x4xf32>
    %18 = vector.broadcast %2 : f32 to vector<16x4xf32>
    %19 = arith.mulf %18, %17 : vector<16x4xf32>
    %c0_10 = arith.constant 0 : index
    %c0_11 = arith.constant 0 : index
    %20 = vector.load %arg6[%c0_10, %c0_11] : memref<16x4xf32, #tpu.memory_space<vmem>>, vector<16x4xf32>
    tpu.vector_store %arg6[%c0_10, %c0_11], %19 {strides = array<i32>} : memref<16x4xf32, #tpu.memory_space<vmem>>, vector<16x4xf32>,
    return
  }
  func.func @transform_0(%arg0: i32, %arg1: i32) -> i32 {
    %c0_i32 = arith.constant 0 : i32
    %c0_i32_0 = arith.constant 0 : i32
    return %c0_i32 : i32
  }
  func.func @transform_1(%arg0: i32, %arg1: i32) -> (i32, i32) {
    %c0_i32 = arith.constant 0 : i32
    %c0_i32_0 = arith.constant 0 : i32
    return %arg0, %c0_i32 : i32, i32
  }
  func.func @transform_2(%arg0: i32, %arg1: i32) -> (i32, i32) {
    %c0_i32 = arith.constant 0 : i32
    %c0_i32_0 = arith.constant 0 : i32
    return %arg1, %c0_i32 : i32, i32
  }
  func.func @transform_3(%arg0: i32, %arg1: i32) -> (i32, i32) {
    %c0_i32 = arith.constant 0 : i32
    %c0_i32_0 = arith.constant 0 : i32
    return %c0_i32, %arg1 : i32, i32
  }
  func.func @transform_4(%arg0: i32, %arg1: i32) -> (i32, i32) {
    %c0_i32 = arith.constant 0 : i32
    return %arg0, %arg1 : i32, i32
  }
}

module attributes {stable_mosaic.version = 11 : i64} {
  func.func @protonet_metric_kernel(%arg0: i32, %arg1: i32, %arg2: memref<1xf32, #tpu.memory_space<smem>>, %arg3: memref<16x32xf32, #tpu.memory_space<vmem>>, %arg4: memref<4x32xf32, #tpu.memory_space<vmem>>, %arg5: memref<1x4xf32, #tpu.memory_space<vmem>>, %arg6: memref<16x4xf32, #tpu.memory_space<vmem>>) attributes {dimension_semantics = [#tpu.dimension_semantics<parallel>, #tpu.dimension_semantics<arbitrary>], iteration_bounds = array<i64: 1, 1>, scalar_prefetch = 0 : i64, scratch_operands = 0 : i64, tpu.core_type = #tpu.core_type<tc>, window_params = [{transform_indices = @transform_0, window_bounds = array<i64: 1>}, {transform_indices = @transform_1, window_bounds = array<i64: 16, 32>}, {transform_indices = @transform_2, window_bounds = array<i64: 4, 32>}, {transform_indices = @transform_3, window_bounds = array<i64: 1, 4>}, {transform_indices = @transform_4, window_bounds = array<i64: 16, 4>}]} {
    %c0 = arith.constant 0 : index
    %0 = memref.load %arg2[%c0] : memref<1xf32, #tpu.memory_space<smem>>
    %cst = arith.constant 1.000000e-16 : f32
    %1 = arith.addf %0, %cst : f32
    %2 = arith.mulf %1, %1 : f32
    %c0_0 = arith.constant 0 : index
    %c0_1 = arith.constant 0 : index
    %3 = vector.load %arg3[%c0_0, %c0_1] : memref<16x32xf32, #tpu.memory_space<vmem>>, vector<16x32xf32>
    %c0_2 = arith.constant 0 : index
    %c0_3 = arith.constant 0 : index
    %4 = vector.load %arg4[%c0_2, %c0_3] : memref<4x32xf32, #tpu.memory_space<vmem>>, vector<4x32xf32>
    %cst_4 = arith.constant dense<0.000000e+00> : vector<16x4xf32>
    %5 = tpu.matmul %3, %4, %cst_4 {dimension_numbers = #tpu.dot_dimension_numbers<[1], [1], [0], [0], [0, 0, 1, 0], [], []>} : vector<16x32xf32>, vector<4x32xf32>, vector<16x4xf32> -> vector<16x4xf32>
    %6 = arith.mulf %3, %3 : vector<16x32xf32>
    %cst_5 = arith.constant dense<0.000000e+00> : vector<16xf32>
    %7 = vector.multi_reduction <add>, %6, %cst_5 [1] : vector<16x32xf32> to vector<16xf32>
    %8 = vector.shape_cast %7 : vector<16xf32> to vector<16x1xf32>
    %c0_6 = arith.constant 0 : index
    %c0_7 = arith.constant 0 : index
    %9 = vector.load %arg5[%c0_6, %c0_7] : memref<1x4xf32, #tpu.memory_space<vmem>>, vector<1x4xf32>
    %10 = vector.broadcast %8 : vector<16x1xf32> to vector<16x4xf32>
    %11 = vector.broadcast %9 : vector<1x4xf32> to vector<16x4xf32>
    %12 = arith.addf %10, %11 : vector<16x4xf32>
    %cst_8 = arith.constant 2.000000e+00 : f32
    %13 = vector.broadcast %cst_8 : f32 to vector<16x4xf32>
    %14 = arith.mulf %13, %5 : vector<16x4xf32>
    %15 = arith.subf %12, %14 : vector<16x4xf32>
    %cst_9 = arith.constant 0.000000e+00 : f32
    %16 = vector.broadcast %cst_9 : f32 to vector<16x4xf32>
    %17 = arith.maximumf %15, %16 : vector<16x4xf32>
    %18 = vector.broadcast %2 : f32 to vector<16x4xf32>
    %19 = arith.mulf %18, %17 : vector<16x4xf32>
    %c0_10 = arith.constant 0 : index
    %c0_11 = arith.constant 0 : index
    %20 = vector.load %arg6[%c0_10, %c0_11] : memref<16x4xf32, #tpu.memory_space<vmem>>, vector<16x4xf32>
    tpu.vector_store %arg6[%c0_10, %c0_11], %19 {strides = array<i32>} : memref<16x4xf32, #tpu.memory_space<vmem>>, vector<16x4xf32>,
    return
  }
  func.func @transform_0(%arg0: i32, %arg1: i32) -> i32 {
    %c0_i32 = arith.constant 0 : i32
    %c0_i32_0 = arith.constant 0 : i32
    return %c0_i32 : i32
  }
  func.func @transform_1(%arg0: i32, %arg1: i32) -> (i32, i32) {
    %c0_i32 = arith.constant 0 : i32
    %c0_i32_0 = arith.constant 0 : i32
    return %arg0, %c0_i32 : i32, i32
  }
  func.func @transform_2(%arg0: i32, %arg1: i32) -> (i32, i32) {
    %c0_i32 = arith.constant 0 : i32
    %c0_i32_0 = arith.constant 0 : i32
    return %arg1, %c0_i32 : i32, i32
  }
  func.func @transform_3(%arg0: i32, %arg1: i32) -> (i32, i32) {
    %c0_i32 = arith.constant 0 : i32
    %c0_i32_0 = arith.constant 0 : i32
    return %c0_i32, %arg1 : i32, i32
  }
  func.func @transform_4(%arg0: i32, %arg1: i32) -> (i32, i32) {
    %c0_i32 = arith.constant 0 : i32
    return %arg0, %arg1 : i32, i32
  }
}

</mosaic_0001>

<bundles_post_ra>
// kernel: tpu_custom_call.1
= control target key start
LH: loop header
LB: loop body
LE: loop exit
PB: predicated region body
PF: predicated region fallthrough
CT: control target
= control target key end

     0   :  { %10 = vsyncpa [#allocation4], 0  ;;  %s277_s0 = inlined_call_operand.<no memory space> [shape: f32[1], index: 0, kind: input, shape index: {}]   ;;  %s278_s1 = inlined_call_operand.hbm [shape: f32[16,32], index: 1, kind: input, shape index: {}]   ;;  %s279_s2 = inlined_call_operand.hbm [shape: f32[4,32], index: 2, kind: input, shape index: {}]   ;;  %s280_s3 = inlined_call_operand.vmem [shape: f32[1,4], index: 3, kind: input, shape index: {}]   ;;  %s281_s4 = inlined_call_operand.vmem [shape: f32[16,4], index: 4, kind: output, shape index: {}]  }
   0x1   :  { %11 = vsyncpa [#allocation6], 0  ;;  %s230_s15 = smov [#allocation3]  }
   0x2   :  { %s19_s16 = sshll.u32 %s230_s15, 4  ;;  %s20_s16 = int_to_ptr.vmem [resolvable:$true] %s19_s16 }
   0x3   :  { %s194_s17 = scalar_lea.vmem %s20_s16, 256  ;;  %p199_p1 = scmp.lt.s32.totalorder %s20_s16, %s20_s16 }
   0x4   :  { %p195_p0 = scmp.ne.s32.totalorder %s20_s16, %s194_s17  ;;  %p200_p2 = scmp.lt.s32.totalorder %s194_s17, %s194_s17 }
   0x6   :  { %p201_p3 = por %p200_p2, %p199_p1 }
   0x8   :  { %p202_p4 = pnand %p201_p3, %p195_p0 }
   0xa   :  { %205 = shalt.err (!%p202_p4)
}
   0xb   :  { %s231_s18 = smov 128   ;;  %s232_s19 = smov 8  }
   0xc   :  { %25 = dma.hbm_to_vmem [thread:$0]  %s278_s1, 256, %s20_s16, [#allocation4], %s231_s18, %s231_s18, %s232_s19  }
   0xd   :  { %s233_s22 = smov [#allocation5]  }
   0xe   :  { %s32_s23 = sshll.u32 %s233_s22, 4  ;;  %s33_s23 = int_to_ptr.vmem [resolvable:$true] %s32_s23 }
   0xf   :  { %s214_s24 = scalar_lea.vmem %s33_s23, 64  ;;  %p219_p6 = scmp.lt.s32.totalorder %s33_s23, %s33_s23 }
  0x10   :  { %p215_p5 = scmp.ne.s32.totalorder %s33_s23, %s214_s24  ;;  %p220_p7 = scmp.lt.s32.totalorder %s214_s24, %s214_s24 }
  0x12   :  { %p221_p8 = por %p220_p7, %p219_p6 }
  0x14   :  { %p222_p9 = pnand %p221_p8, %p215_p5 }
  0x16   :  { %225 = shalt.err (!%p222_p9)
}
  0x17   :  { %35 = dma.hbm_to_vmem [thread:$0]  %s279_s2, 64, %s33_s23, [#allocation6]  }
  0x18   :  { %226 = dma.done.wait [#allocation4], 256  }
  0x19   :  { %227 = vsyncadd [#allocation4], 4294967040 }
  0x1a   :  { %228 = dma.done.wait [#allocation6], 64  }
  0x1b   :  { %229 = vsyncadd [#allocation6], 4294967232  ;;  %vm50_vm0 = vcmask 261120   ;;  %v49_v0 = vld [vmem:[#allocation5] sm:$0xf]  ;;  %v47_v1 = vld [vmem:[#allocation3] sm:$0xff] }
  0x1c   :  { %v48_v2 = vld [vmem:[#allocation3 + $0x8] sm:$0xff]  ;;  %177 = vmatprep.subr.msk.mxu0 %vm50_vm0, %v49_v0  ;;  %179 = vmatprep.mubr.msk.f32.mxu0 %vm50_vm0, %v47_v1  ;;  %v135_v3 = vmul.f32 %v47_v1, %v47_v1  ;;  %s45_s27 = sadd.f32 1e-16, %s277_s0  ;;  %v173_v9 = vld [vmem:[%s280_s3] ss:$0 sm:$0xff]  ;;  %vm161_vm1 = vcmask 31744  }
  0x1d   :  { %v136_v4 = vmul.f32 %v48_v2, %v48_v2  ;;  %178 = vmatpush3.xpose.msk.msra.mxu0 %vm50_vm0, %v49_v0 }
  0x1e   :  { %v137_v5 = vsel %vm50_vm0, %v135_v3, 0.0  ;;  %s46_s30 = smul.f32 %s45_s27, %s45_s27 }
  0x1f   :  { %138 = vadd.xlane.f32.xlu0 %v137_v5  ;;  %v140_v6 = vsel %vm50_vm0, %v136_v4, 0.0 }
  0x20   :  { %180 = vmatmul.mubr.msk.f32.vlgmr.msra.gmra.mxu0 %vm50_vm0, %v48_v2  ;;  %v158_v17 = vstv %s46_s30 }
  0x23   :  { %141 = vadd.xlane.f32.xlu0 %v140_v6 }
  0xa8   :  { %v139_v7 = vpop.xlane.xlu0 %138 }
  0xa9   :  { %v150_v14 = vadd.f32 %v173_v9, %v139_v7 }
  0xac   :  { %v142_v8 = vpop.xlane.xlu0 %141 }
  0xad   :  { %v151_v10 = vadd.f32 %v173_v9, %v142_v8 }
  0xe0   :  { %v181_v11 = vpop.f32.mrf.mxu0 }
  0xe1   :  { %v153_v12 = vmul.f32 2.0, %v181_v11 }
  0xe2   :  { %v126_v13 = vpop.f32.mrf.mxu0 }
  0xe3   :  { %v155_v15 = vsub.f32 %v151_v10, %v153_v12  ;;  %v152_v16 = vmul.f32 2.0, %v126_v13 }
  0xe5   :  { %v157_v18 = vmax.f32 %v155_v15, 0.0  ;;  %v154_v19 = vsub.f32 %v150_v14, %v152_v16 }
  0xe7   :  { %v160_v20 = vmul.f32 %v158_v17, %v157_v18  ;;  %v156_v21 = vmax.f32 %v154_v19, 0.0 }
  0xe9   :  { %163 = vst.msk [vmem:[%s281_s4 + $0x8] sm:$0xff] %vm161_vm1, %v160_v20  ;;  %v159_v22 = vmul.f32 %v158_v17, %v156_v21 }
  0xeb   :  { %162 = vst.msk [vmem:[%s281_s4] sm:$0xff] %vm161_vm1, %v159_v22 }
  0xec   :  { %168 = vsyncpa [#allocation4], 1 }
  0xed   :  { %169 = vsyncpa [#allocation6], 1 }

// kernel: tpu_custom_call.1
= control target key start
LH: loop header
LB: loop body
LE: loop exit
PB: predicated region body
PF: predicated region fallthrough
CT: control target
= control target key end

     0   :  { %10 = vsyncpa [#allocation4], 0  ;;  %s277_s0 = inlined_call_operand.<no memory space> [shape: f32[1], index: 0, kind: input, shape index: {}]   ;;  %s278_s1 = inlined_call_operand.hbm [shape: f32[16,32], index: 1, kind: input, shape index: {}]   ;;  %s279_s2 = inlined_call_operand.hbm [shape: f32[4,32], index: 2, kind: input, shape index: {}]   ;;  %s280_s3 = inlined_call_operand.vmem [shape: f32[1,4], index: 3, kind: input, shape index: {}]   ;;  %s281_s4 = inlined_call_operand.vmem [shape: f32[16,4], index: 4, kind: output, shape index: {}]  }
   0x1   :  { %11 = vsyncpa [#allocation6], 0  ;;  %s230_s15 = smov [#allocation3]  }
   0x2   :  { %s19_s16 = sshll.u32 %s230_s15, 4  ;;  %s20_s16 = int_to_ptr.vmem [resolvable:$true] %s19_s16 }
   0x3   :  { %s194_s17 = scalar_lea.vmem %s20_s16, 256  ;;  %p199_p1 = scmp.lt.s32.totalorder %s20_s16, %s20_s16 }
   0x4   :  { %p195_p0 = scmp.ne.s32.totalorder %s20_s16, %s194_s17  ;;  %p200_p2 = scmp.lt.s32.totalorder %s194_s17, %s194_s17 }
   0x6   :  { %p201_p3 = por %p200_p2, %p199_p1 }
   0x8   :  { %p202_p4 = pnand %p201_p3, %p195_p0 }
   0xa   :  { %205 = shalt.err (!%p202_p4)
}
   0xb   :  { %s231_s18 = smov 128   ;;  %s232_s19 = smov 8  }
   0xc   :  { %25 = dma.hbm_to_vmem [thread:$0]  %s278_s1, 256, %s20_s16, [#allocation4], %s231_s18, %s231_s18, %s232_s19  }
   0xd   :  { %s233_s22 = smov [#allocation5]  }
   0xe   :  { %s32_s23 = sshll.u32 %s233_s22, 4  ;;  %s33_s23 = int_to_ptr.vmem [resolvable:$true] %s32_s23 }
   0xf   :  { %s214_s24 = scalar_lea.vmem %s33_s23, 64  ;;  %p219_p6 = scmp.lt.s32.totalorder %s33_s23, %s33_s23 }
  0x10   :  { %p215_p5 = scmp.ne.s32.totalorder %s33_s23, %s214_s24  ;;  %p220_p7 = scmp.lt.s32.totalorder %s214_s24, %s214_s24 }
  0x12   :  { %p221_p8 = por %p220_p7, %p219_p6 }
  0x14   :  { %p222_p9 = pnand %p221_p8, %p215_p5 }
  0x16   :  { %225 = shalt.err (!%p222_p9)
}
  0x17   :  { %35 = dma.hbm_to_vmem [thread:$0]  %s279_s2, 64, %s33_s23, [#allocation6]  }
  0x18   :  { %226 = dma.done.wait [#allocation4], 256  }
  0x19   :  { %227 = vsyncadd [#allocation4], 4294967040 }
  0x1a   :  { %228 = dma.done.wait [#allocation6], 64  }
  0x1b   :  { %229 = vsyncadd [#allocation6], 4294967232  ;;  %vm50_vm0 = vcmask 261120   ;;  %v49_v0 = vld [vmem:[#allocation5] sm:$0xf]  ;;  %v47_v1 = vld [vmem:[#allocation3] sm:$0xff] }
  0x1c   :  { %v48_v2 = vld [vmem:[#allocation3 + $0x8] sm:$0xff]  ;;  %177 = vmatprep.subr.msk.mxu0 %vm50_vm0, %v49_v0  ;;  %179 = vmatprep.mubr.msk.f32.mxu0 %vm50_vm0, %v47_v1  ;;  %v135_v3 = vmul.f32 %v47_v1, %v47_v1  ;;  %s45_s27 = sadd.f32 1e-16, %s277_s0  ;;  %v173_v9 = vld [vmem:[%s280_s3] ss:$0 sm:$0xff]  ;;  %vm161_vm1 = vcmask 31744  }
  0x1d   :  { %v136_v4 = vmul.f32 %v48_v2, %v48_v2  ;;  %178 = vmatpush3.xpose.msk.msra.mxu0 %vm50_vm0, %v49_v0 }
  0x1e   :  { %v137_v5 = vsel %vm50_vm0, %v135_v3, 0.0  ;;  %s46_s30 = smul.f32 %s45_s27, %s45_s27 }
  0x1f   :  { %138 = vadd.xlane.f32.xlu0 %v137_v5  ;;  %v140_v6 = vsel %vm50_vm0, %v136_v4, 0.0 }
  0x20   :  { %180 = vmatmul.mubr.msk.f32.vlgmr.msra.gmra.mxu0 %vm50_vm0, %v48_v2  ;;  %v158_v17 = vstv %s46_s30 }
  0x23   :  { %141 = vadd.xlane.f32.xlu0 %v140_v6 }
  0xa8   :  { %v139_v7 = vpop.xlane.xlu0 %138 }
  0xa9   :  { %v150_v14 = vadd.f32 %v173_v9, %v139_v7 }
  0xac   :  { %v142_v8 = vpop.xlane.xlu0 %141 }
  0xad   :  { %v151_v10 = vadd.f32 %v173_v9, %v142_v8 }
  0xe0   :  { %v181_v11 = vpop.f32.mrf.mxu0 }
  0xe1   :  { %v153_v12 = vmul.f32 2.0, %v181_v11 }
  0xe2   :  { %v126_v13 = vpop.f32.mrf.mxu0 }
  0xe3   :  { %v155_v15 = vsub.f32 %v151_v10, %v153_v12  ;;  %v152_v16 = vmul.f32 2.0, %v126_v13 }
  0xe5   :  { %v157_v18 = vmax.f32 %v155_v15, 0.0  ;;  %v154_v19 = vsub.f32 %v150_v14, %v152_v16 }
  0xe7   :  { %v160_v20 = vmul.f32 %v158_v17, %v157_v18  ;;  %v156_v21 = vmax.f32 %v154_v19, 0.0 }
  0xe9   :  { %163 = vst.msk [vmem:[%s281_s4 + $0x8] sm:$0xff] %vm161_vm1, %v160_v20  ;;  %v159_v22 = vmul.f32 %v158_v17, %v156_v21 }
  0xeb   :  { %162 = vst.msk [vmem:[%s281_s4] sm:$0xff] %vm161_vm1, %v159_v22 }
  0xec   :  { %168 = vsyncpa [#allocation4], 1 }
  0xed   :  { %169 = vsyncpa [#allocation6], 1 }

</bundles_post_ra>
